<compile_context>
chip_gen: v7x
topology: tpu7x:2x2x1
jax: 0.10.0
libtpu: 0.0.40
codegen_flags: <defaults>
</compile_context>

<pallas_src>
import functools

import jax
import jax.numpy as jnp
from jax.experimental import pallas as pl
from jax.experimental.pallas import tpu as pltpu


def _round_up(x, m):
    return (x + m - 1) // m * m


def conv_bn_silu_kernel(x_ref, w_ref, scale_ref, bias_ref, o_ref):
    """
    x_ref:     (1, TH*Wp, K*K*C1)  im2col rows for this tile (bf16)
    w_ref:     (K*K*C1, C2p)       packed conv weights (bf16), C2 zero-padded to C2p
    scale_ref: (1, C2p)            folded BN scale = gamma / sqrt(var + eps)   (f32)
    bias_ref:  (1, C2p)            folded BN bias  = beta - mean * scale       (f32)
    o_ref:     (1, TH*Wp, C2p)     lane-dense wide output tile (bf16)
    """
    # Single deep matmul (contraction = K*K*C1), f32 accumulation on the MXU.
    acc = jnp.dot(x_ref[0], w_ref[...], preferred_element_type=jnp.float32)
    y = acc * scale_ref[...] + bias_ref[...]      # folded BatchNorm (eval semantics)
    y = y * jax.nn.sigmoid(y)                     # SiLU
    o_ref[0] = y.astype(o_ref.dtype)              # store shape == compute shape (unmasked vst)


@functools.partial(jax.jit, static_argnames=("k",))
def conv_module_forward(x_nchw, weight_oihw, gamma, beta, run_mean, run_var,
                        k=3, eps=1e-5):
    """Equivalent of Conv.forward(x): act(bn(conv(x))), NCHW in / NCHW out."""
    N, C1, H, W = x_nchw.shape
    C2 = weight_oihw.shape[0]
    assert weight_oihw.shape == (C2, C1, k, k), "only groups=1 supported"
    assert k % 2 == 1, "autopad2 path implemented for odd k only"
    # TODO(synk): stride!=1, dilation!=1, groups!=1 and conv bias are not implemented.

    p = k // 2
    Hp, Wp = H + 2 * p, W + 2 * p
    KKC1 = k * k * C1
    C2p = _round_up(C2, 128)            # lane-dense output channels

    TH = 8                               # row tile: TH*Wp rows, always sublane aligned
    Hpad = _round_up(H, TH)
    HT = Hpad // TH
    thwp = TH * Wp

    # --- boundary glue (NCHW API): transpose + pad + im2col pack, fused by XLA ---
    # TODO(synk): accept NHWC from the producer / hand the wide NHWC slab to the
    # consumer to drop the layout round trips entirely.
    x_nhwc = jnp.transpose(x_nchw, (0, 2, 3, 1))                   # N,H,W,C1
    x_pad = jnp.pad(x_nhwc, ((0, 0), (p, p), (p, p), (0, 0)))      # N,Hp,Wp,C1
    x_flat = x_pad.reshape(N, Hp * Wp, C1)
    max_shift = 2 * p * Wp + 2 * p                                 # largest tap offset
    tail = max_shift + Hpad * Wp - Hp * Wp
    x_flat = jnp.pad(x_flat, ((0, 0), (0, tail), (0, 0)))
    # Pack all K*K taps into the contraction axis (im2col-lite).
    taps = [x_flat[:, kh * Wp + kw: kh * Wp + kw + Hpad * Wp, :]
            for kh in range(k) for kw in range(k)]
    x_cols = jnp.concatenate(taps, axis=-1).astype(jnp.bfloat16)   # N, Hpad*Wp, K*K*C1

    # Weights packed to (K*K*C1, C2p): row = (kh*k + kw)*C1 + c1, matching x_cols order.
    w_packed = jnp.transpose(weight_oihw, (2, 3, 1, 0)).reshape(KKC1, C2)
    w_packed = jnp.pad(w_packed, ((0, 0), (0, C2p - C2))).astype(jnp.bfloat16)

    scale = gamma / jnp.sqrt(run_var + eps)                        # (C2,)
    bias = beta - run_mean * scale
    scale2 = jnp.pad(scale, (0, C2p - C2), constant_values=1.0)
    scale2 = scale2.reshape(1, C2p).astype(jnp.float32)
    bias2 = jnp.pad(bias, (0, C2p - C2)).reshape(1, C2p).astype(jnp.float32)

    out_wide = pl.pallas_call(
        conv_bn_silu_kernel,
        out_shape=jax.ShapeDtypeStruct((N, Hpad * Wp, C2p), jnp.bfloat16),
        grid_spec=pltpu.PrefetchScalarGridSpec(
            num_scalar_prefetch=0,
            grid=(N, HT),
            in_specs=[
                pl.BlockSpec((1, thwp, KKC1), lambda n, t: (n, t, 0)),   # per-tile window
                pl.BlockSpec((KKC1, C2p), lambda n, t: (0, 0)),          # packed weights
                pl.BlockSpec((1, C2p), lambda n, t: (0, 0)),
                pl.BlockSpec((1, C2p), lambda n, t: (0, 0)),
            ],
            out_specs=pl.BlockSpec((1, thwp, C2p), lambda n, t: (n, t, 0)),
        ),
        compiler_params=pltpu.CompilerParams(
            dimension_semantics=("parallel", "parallel"),
            vmem_limit_bytes=32 * 1024 * 1024),
    )(x_cols, w_packed, scale2, bias2)

    # Crop the wide rows (columns w in [W, Wp) are scratch), padded H rows and
    # padded channels, then return in the module's NCHW layout.
    out_nhwc = out_wide.reshape(N, Hpad, Wp, C2p)[:, :H, :W, :C2]
    return jnp.transpose(out_nhwc, (0, 3, 1, 2)).astype(x_nchw.dtype)


def reference_forward(x_nchw, weight_oihw, gamma, beta, run_mean, run_var,
                      k=3, eps=1e-5):
    """Pure-JAX reference (f32 lax conv) for correctness checking."""
    p = k // 2
    y = jax.lax.conv_general_dilated(
        x_nchw, weight_oihw,
        window_strides=(1, 1), padding=((p, p), (p, p)),
        dimension_numbers=("NCHW", "OIHW", "NCHW"))
    scale = gamma / jnp.sqrt(run_var + eps)
    bias = beta - run_mean * scale
    y = y * scale[None, :, None, None] + bias[None, :, None, None]
    return y * jax.nn.sigmoid(y)


if __name__ == "__main__":
    key = jax.random.PRNGKey(0)
    kx, kw_, kg, kb, km, kv = jax.random.split(key, 6)

    # Module config: Conv(c1=4, c2=8, k=3) -> pad=1, stride=1, groups=1, dilation=1
    N, C1, H, W = 2, 4, 16, 16
    C2, K = 8, 3

    x = jax.random.normal(kx, (N, C1, H, W), jnp.float32)
    weight = jax.random.normal(kw_, (C2, C1, K, K), jnp.float32) * 0.1
    # Deterministic BatchNorm params (eval-mode / running-stats semantics).
    gamma = 1.0 + 0.1 * jax.random.normal(kg, (C2,), jnp.float32)
    beta = 0.1 * jax.random.normal(kb, (C2,), jnp.float32)
    run_mean = 0.1 * jax.random.normal(km, (C2,), jnp.float32)
    run_var = jnp.abs(1.0 + 0.1 * jax.random.normal(kv, (C2,), jnp.float32))

    out = conv_module_forward(x, weight, gamma, beta, run_mean, run_var, k=K)
    out = jax.block_until_ready(out)

    ref = reference_forward(x, weight, gamma, beta, run_mean, run_var, k=K)
    assert out.shape == (N, C2, H, W)
    # bf16 MXU operands + bf16 output slab with f32 accumulation/BN/SiLU ->
    # loosened tolerance vs the f32 reference (documented, expected ~<1% rel error).
    assert jnp.allclose(out, ref, atol=3e-2, rtol=3e-2), "mismatch vs reference"

    print("KERNEL_OK")
</pallas_src>

<mosaic_0001>
module attributes {stable_mosaic.version = 11 : i64} {
  func.func @conv_bn_silu_kernel(%arg0: i32, %arg1: i32, %arg2: memref<1x144x36xbf16, #tpu.memory_space<vmem>>, %arg3: memref<36x128xbf16, #tpu.memory_space<vmem>>, %arg4: memref<1x128xf32, #tpu.memory_space<vmem>>, %arg5: memref<1x128xf32, #tpu.memory_space<vmem>>, %arg6: memref<1x144x128xbf16, #tpu.memory_space<vmem>>) attributes {dimension_semantics = [#tpu.dimension_semantics<parallel>, #tpu.dimension_semantics<parallel>], iteration_bounds = array<i64: 2, 2>, scalar_prefetch = 0 : i64, scratch_operands = 0 : i64, tpu.core_type = #tpu.core_type<tc>, window_params = [{transform_indices = @transform_0, window_bounds = array<i64: 1, 144, 36>}, {pipeline_mode = #tpu.pipeline_mode<synchronous>, transform_indices = @transform_1, window_bounds = array<i64: 36, 128>}, {pipeline_mode = #tpu.pipeline_mode<synchronous>, transform_indices = @transform_2, window_bounds = array<i64: 1, 128>}, {pipeline_mode = #tpu.pipeline_mode<synchronous>, transform_indices = @transform_3, window_bounds = array<i64: 1, 128>}, {transform_indices = @transform_4, window_bounds = array<i64: 1, 144, 128>}]} {
    %c0 = arith.constant 0 : index
    %c0_0 = arith.constant 0 : index
    %c0_1 = arith.constant 0 : index
    %0 = vector.load %arg2[%c0, %c0_0, %c0_1] : memref<1x144x36xbf16, #tpu.memory_space<vmem>>, vector<1x144x36xbf16>
    %1 = vector.shape_cast %0 : vector<1x144x36xbf16> to vector<144x36xbf16>
    %c0_2 = arith.constant 0 : index
    %c0_3 = arith.constant 0 : index
    %2 = vector.load %arg3[%c0_2, %c0_3] : memref<36x128xbf16, #tpu.memory_space<vmem>>, vector<36x128xbf16>
    %cst = arith.constant dense<0.000000e+00> : vector<144x128xf32>
    %3 = tpu.matmul %1, %2, %cst {dimension_numbers = #tpu.dot_dimension_numbers<[1], [0], [0], [1], [0, 0, 1, 1], [], []>} : vector<144x36xbf16>, vector<36x128xbf16>, vector<144x128xf32> -> vector<144x128xf32>
    %c0_4 = arith.constant 0 : index
    %c0_5 = arith.constant 0 : index
    %4 = vector.load %arg4[%c0_4, %c0_5] : memref<1x128xf32, #tpu.memory_space<vmem>>, vector<1x128xf32>
    %5 = vector.broadcast %4 : vector<1x128xf32> to vector<144x128xf32>
    %6 = arith.mulf %3, %5 : vector<144x128xf32>
    %c0_6 = arith.constant 0 : index
    %c0_7 = arith.constant 0 : index
    %7 = vector.load %arg5[%c0_6, %c0_7] : memref<1x128xf32, #tpu.memory_space<vmem>>, vector<1x128xf32>
    %8 = vector.broadcast %7 : vector<1x128xf32> to vector<144x128xf32>
    %9 = arith.addf %6, %8 : vector<144x128xf32>
    %10 = arith.negf %9 : vector<144x128xf32>
    %11 = math.exp %10 : vector<144x128xf32>
    %cst_8 = arith.constant 1.000000e+00 : f32
    %12 = vector.broadcast %cst_8 : f32 to vector<144x128xf32>
    %13 = arith.addf %12, %11 : vector<144x128xf32>
    %14 = arith.divf %12, %13 : vector<144x128xf32>
    %15 = arith.mulf %9, %14 : vector<144x128xf32>
    %16 = arith.truncf %15 : vector<144x128xf32> to vector<144x128xbf16>
    %c0_9 = arith.constant 0 : index
    %c0_10 = arith.constant 0 : index
    %c0_11 = arith.constant 0 : index
    %17 = vector.load %arg6[%c0_9, %c0_10, %c0_11] : memref<1x144x128xbf16, #tpu.memory_space<vmem>>, vector<1x144x128xbf16>
    %18 = vector.shape_cast %17 : vector<1x144x128xbf16> to vector<144x128xbf16>
    %19 = vector.shape_cast %16 : vector<144x128xbf16> to vector<1x144x128xbf16>
    tpu.vector_store %arg6[%c0_9, %c0_10, %c0_11], %19 {strides = array<i32>} : memref<1x144x128xbf16, #tpu.memory_space<vmem>>, vector<1x144x128xbf16>,
    return
  }
  func.func @transform_0(%arg0: i32, %arg1: i32) -> (i32, i32, i32) {
    %c0_i32 = arith.constant 0 : i32
    %c0_i32_0 = arith.constant 0 : i32
    return %arg0, %arg1, %c0_i32 : i32, i32, i32
  }
  func.func @transform_1(%arg0: i32, %arg1: i32) -> (i32, i32) {
    %c0_i32 = arith.constant 0 : i32
    %c0_i32_0 = arith.constant 0 : i32
    %c0_i32_1 = arith.constant 0 : i32
    return %c0_i32, %c0_i32_0 : i32, i32
  }
  func.func @transform_2(%arg0: i32, %arg1: i32) -> (i32, i32) {
    %c0_i32 = arith.constant 0 : i32
    %c0_i32_0 = arith.constant 0 : i32
    %c0_i32_1 = arith.constant 0 : i32
    return %c0_i32, %c0_i32_0 : i32, i32
  }
  func.func @transform_3(%arg0: i32, %arg1: i32) -> (i32, i32) {
    %c0_i32 = arith.constant 0 : i32
    %c0_i32_0 = arith.constant 0 : i32
    %c0_i32_1 = arith.constant 0 : i32
    return %c0_i32, %c0_i32_0 : i32, i32
  }
  func.func @transform_4(%arg0: i32, %arg1: i32) -> (i32, i32, i32) {
    %c0_i32 = arith.constant 0 : i32
    %c0_i32_0 = arith.constant 0 : i32
    return %arg0, %arg1, %c0_i32 : i32, i32, i32
  }
}

</mosaic_0001>

<bundles_post_ra>
// kernel: conv_module_forward.1
= control target key start
LH: loop header
LB: loop body
LE: loop exit
PB: predicated region body
PF: predicated region fallthrough
CT: control target
= control target key end

     0   :  { %s1207_s15 = smov 0   ;;  %s1209_s16 = smov 0   ;;  %s1424_s0 = inlined_call_operand.vmem [shape: bf16[2,288,36], index: 0, kind: input, shape index: {}]   ;;  %s1425_s1 = inlined_call_operand.vmem [shape: bf16[36,128], index: 1, kind: input, shape index: {}]   ;;  %s1426_s2 = inlined_call_operand.vmem [shape: f32[1,128], index: 2, kind: input, shape index: {}]   ;;  %s1427_s3 = inlined_call_operand.vmem [shape: f32[1,128], index: 3, kind: input, shape index: {}]   ;;  %s1428_s4 = inlined_call_operand.vmem [shape: bf16[2,288,128], index: 4, kind: output, shape index: {}]  }
   0x1   :  { %s1211_s17 = smov 0   ;;  %s1213_s18 = smov 0  }
   0x2   :  { %s1215_s19 = smov 0  }
   0x3 LB: > { %s23_s20 = sadd.s32 1, %s1170_s17  ;;  %s26_s21 = sadd.s32 1, %s1174_s18  ;;  %s1178_s19 = sphi %s1215_s19, %s14_s19   ;;  %s1174_s18 = sphi %s1213_s18, %s1432_s18   ;;  %s1170_s17 = sphi %s1211_s17, %s1431_s17   ;;  %s1166_s16 = sphi %s1209_s16, %s1430_s16   ;;  %s1162_s15 = sphi %s1207_s15, %s1429_s15  }
   0x4   : > { %p24_p0 = scmp.ge.s32.totalorder %s23_s20, 2  ;;  %p818_p1 = scmp.ge.s32.totalorder %s1178_s19, 1 }
   0x5   : > { %p183_p2 = scmp.lt.s32.totalorder %s1178_s19, 5 }
   0x6   : > { %s1434_s20 = smov (%p24_p0, %s23_s20), 0  ;;  %s1436_s21 = smov (!%p24_p0, %s26_s21), %s1174_s18 }
   0x7   : > { %p184_p3 = pnand %p818_p1, %p183_p2  ;;  %p28_p4 = scmp.ge.s32.totalorder %s1436_s21, 2 }
   0x8   : > { %v1056_v0 = vld [vmem:[%s1425_s1] sm:$0xff] (!%p184_p3)   ;;  %v1180_v1 = vmov (!%p184_p3), 0.0   ;;  %v1057_v2 = vld [vmem:[%s1425_s1 + $0x8] sm:$0xff] (!%p184_p3)   ;;  %v1058_v3 = vld [vmem:[%s1425_s1 + $0x10] ss:$0 sps:$4 sm:$0x33] (!%p184_p3)  }
   0x9   : > { %s1438_s21 = smov (%p28_p4, %s1436_s21), 0  ;;  %187 = sbr.rel (%p184_p3) target bundleno = 306 (0x132), region = 36 }
   0xa   : > { %965 = vmatprep.subr.bf16.mxu0 (!%p184_p3), %v1180_v1  ;;  %1007 = vmatprep.subr.bf16.mxu1 (!%p184_p3), %v1180_v1  ;;  %s217_s28 = smul.u32 (!%p184_p3), 18, %s1162_s15  ;;  %p218_p5 = scmp.lt.s32.totalorder (!%p184_p3), %s1166_s16, 1  ;;  %vm349_vm0 = vcmask (!%p184_p3), 1041408   ;;  %vm1181_vm1 = vmmov (!%p184_p3), 0   ;;  %vm321_vm2 = vcmask (!%p184_p3), 293888  }
   0xb   : > { %966 = vmatpush3.bf16.msra.mxu0 (!%p184_p3), %v1056_v0  ;;  %1010 = vmatpush3.bf16.msra.mxu1 (!%p184_p3), %v1056_v0  ;;  %v351_v4 = vsel (!%p184_p3), %vm349_vm0, %v1058_v3, 0  ;;  %v1282_v14 = vld [vmem:[%s1426_s2] ss:$0 sm:$0xff] (!%p184_p3) }
   0xc   : > { %967 = vmatprep.subr.bf16.mxu0 (!%p184_p3), %v1180_v1  ;;  %1008 = vmatprep.subr.bf16.mxu1 (!%p184_p3), %v1180_v1  ;;  %p220_p6 = scmp.lt.s32.totalorder (!%p184_p3), %s217_s28, 35  ;;  %v1287_v16 = vld [vmem:[%s1427_s3] ss:$0 sm:$0xff] (!%p184_p3) }
   0xd   : > { %971 = vmatprep.mubr.msk.bf16.mxu0 (!%p184_p3), %vm1181_vm1, %v1180_v1  ;;  %991 = vmatprep.mubr.msk.bf16.mxu1 (!%p184_p3), %vm1181_vm1, %v1180_v1 }
   0xf   : > { %968 = vmatpush3.bf16.msra.mxu0 (!%p184_p3), %v1057_v2  ;;  %1011 = vmatpush3.bf16.msra.mxu1 (!%p184_p3), %v1057_v2 }
  0x10   : > { %s1440_s16 = smov (!%p218_p5, %s1166_s16), 1  ;;  %969 = vmatprep.subr.bf16.mxu0 %v1180_v1  ;;  %1009 = vmatprep.subr.bf16.mxu1 %v1180_v1  ;;  %s1442_s28 = smov (!%p220_p6, %s217_s28), 35 }
  0x11   : > { %s1013_s29 = smul.u32 36, %s1440_s16 }
  0x13   : > { %970 = vmatpush3.bf16.msra.mxu0 %v351_v4  ;;  %1012 = vmatpush3.bf16.msra.mxu1 %v351_v4  ;;  %s1255_s30 = sadd.s32 %s1013_s29, %s1442_s28 }
  0x14   : > { %s819_s5 = sshll.u32 %s1255_s30, 2 }
  0x15   : > { %s225_s8 = scalar_lea.vmem %s1424_s0, %s819_s5  ;;  %s1378_s15 = scalar_lea.vmem %s1428_s4, %s819_s5 }
  0x16   : > { %v1059_v5 = vld [vmem:[%s225_s8] sm:$0xff]   ;;  %v1060_v6 = vld [vmem:[%s225_s8 + $0x28] sm:$0xff]   ;;  %v1062_v8 = vld [vmem:[%s225_s8 + $0x30] sm:$0xff]  }
  0x17   : > { %972 = vmatmul.mubr.msk.bf16.vlgmr.msra.gmra.mrb[0].mxu0 %vm321_vm2, %v1059_v5  ;;  %992 = vmatmul.mubr.msk.bf16.vlgmr.msra.gmra.mrb[0].mxu1 %vm321_vm2, %v1060_v6  ;;  %v1061_v7 = vld [vmem:[%s225_s8 + $0x8] sm:$0xff]   ;;  %v1063_v9 = vld [vmem:[%s225_s8 + $0x10] sm:$0xff]   ;;  %v1064_v10 = vld [vmem:[%s225_s8 + $0x38] sm:$0xff]  }
  0x18   : > { %975 = vmatprep.mubr.msk.bf16.mxu0 %vm1181_vm1, %v1180_v1  ;;  %995 = vmatprep.mubr.msk.bf16.mxu1 %vm1181_vm1, %v1180_v1  ;;  %v1065_v11 = vld [vmem:[%s225_s8 + $0x18] sm:$0xff]   ;;  %v1066_v12 = vld [vmem:[%s225_s8 + $0x40] sm:$0xff]  }
  0x19   : > { %v1067_v13 = vld [vmem:[%s225_s8 + $0x20] sm:$0xff]  }
  0x1f   : > { %976 = vmatmul.mubr.msk.bf16.gmra.mrb[4].mxu0 %vm321_vm2, %v1061_v7  ;;  %996 = vmatmul.mubr.msk.bf16.gmra.mrb[4].mxu1 %vm321_vm2, %v1062_v8 }
  0x20   : > { %979 = vmatprep.mubr.msk.bf16.mxu0 %vm1181_vm1, %v1180_v1  ;;  %999 = vmatprep.mubr.msk.bf16.mxu1 %vm1181_vm1, %v1180_v1 }
  0x27   : > { %980 = vmatmul.mubr.msk.bf16.gmra.mrb[8].mxu0 %vm321_vm2, %v1063_v9  ;;  %1000 = vmatmul.mubr.msk.bf16.gmra.mrb[8].mxu1 %vm321_vm2, %v1064_v10 }
  0x28   : > { %983 = vmatprep.mubr.msk.bf16.mxu0 %vm1181_vm1, %v1180_v1  ;;  %1003 = vmatprep.mubr.msk.bf16.mxu1 %vm1181_vm1, %v1180_v1 }
  0x2f   : > { %984 = vmatmul.mubr.msk.bf16.gmra.mrb[12].mxu0 %vm321_vm2, %v1065_v11  ;;  %1004 = vmatmul.mubr.msk.bf16.gmra.mrb[12].mxu1 %vm321_vm2, %v1066_v12 }
  0x30   : > { %987 = vmatprep.mubr.msk.bf16.mxu0 %vm1181_vm1, %v1180_v1 }
  0x37   : > { %988 = vmatmul.mubr.msk.bf16.gmra.mrb[16].mxu0 %vm321_vm2, %v1067_v13 }
  0xea   : > { %v387_v15 = vpop.f32.mrb[0].mxu0  ;;  %v427_v18 = vpop.f32.mrb[0].mxu1 }
  0xeb   : > { %v465_v17 = vmul.f32 %v1282_v14, %v387_v15  ;;  %v973_v19 = vpop.f32.mrb[1].mxu0  ;;  %v475_v20 = vmul.f32 %v1282_v14, %v427_v18  ;;  %v993_v21 = vpop.f32.mrb[1].mxu1 }
  0xec   : > { %v390_v22 = vpop.f32.mrb[2].mxu0  ;;  %v430_v25 = vpop.f32.mrb[2].mxu1 }
  0xed   : > { %v1292_v23 = vadd.f32 %v1287_v16, %v465_v17  ;;  %v466_v24 = vmul.f32 %v1282_v14, %v390_v22  ;;  %v974_v26 = vpop.f32.mrb[3].mxu0  ;;  %v1296_v27 = vadd.f32 %v1287_v16, %v475_v20  ;;  %v476_v28 = vmul.f32 %v1282_v14, %v430_v25  ;;  %v994_v29 = vpop.f32.mrb[3].mxu1 }
  0xef   : > { %v844_v30 = vmul.f32 -1.442695, %v1292_v23  ;;  %v1301_v31 = vadd.f32 %v1287_v16, %v466_v24  ;;  %v854_v32 = vmul.f32 -1.442695, %v1296_v27  ;;  %v1305_v33 = vadd.f32 %v1287_v16, %v476_v28 }
  0xf1   : > { %1068 = vpow2.f32 %v844_v30  ;;  %v845_v34 = vmul.f32 -1.442695, %v1301_v31  ;;  %v855_v35 = vmul.f32 -1.442695, %v1305_v33 }
  0xf2   : > { %1070 = vpow2.f32 %v854_v32  ;;  %v395_v36 = vpop.f32.mrb[4].mxu0  ;;  %v435_v38 = vpop.f32.mrb[4].mxu1 }
  0xf3   : > { %1072 = vpow2.f32 %v845_v34  ;;  %v467_v37 = vmul.f32 %v1282_v14, %v395_v36  ;;  %v977_v39 = vpop.f32.mrb[5].mxu0  ;;  %v477_v40 = vmul.f32 %v1282_v14, %v435_v38  ;;  %v997_v41 = vpop.f32.mrb[5].mxu1 }
  0xf4   : > { %1074 = vpow2.f32 %v855_v35  ;;  %v398_v42 = vpop.f32.mrb[6].mxu0  ;;  %v438_v45 = vpop.f32.mrb[6].mxu1 }
  0xf5   : > { %v1312_v43 = vadd.f32 %v1287_v16, %v467_v37  ;;  %v468_v44 = vmul.f32 %v1282_v14, %v398_v42  ;;  %v978_v46 = vpop.f32.mrb[7].mxu0  ;;  %v1316_v47 = vadd.f32 %v1287_v16, %v477_v40  ;;  %v478_v48 = vmul.f32 %v1282_v14, %v438_v45  ;;  %v998_v49 = vpop.f32.mrb[7].mxu1 }
  0xf7   : > { %v846_v50 = vmul.f32 -1.442695, %v1312_v43  ;;  %v1321_v51 = vadd.f32 %v1287_v16, %v468_v44  ;;  %v856_v52 = vmul.f32 -1.442695, %v1316_v47  ;;  %v1325_v53 = vadd.f32 %v1287_v16, %v478_v48 }
  0xf9   : > { %1076 = vpow2.f32 %v846_v50  ;;  %v847_v54 = vmul.f32 -1.442695, %v1321_v51  ;;  %v857_v55 = vmul.f32 -1.442695, %v1325_v53 }
  0xfa   : > { %1078 = vpow2.f32 %v856_v52  ;;  %v403_v56 = vpop.f32.mrb[8].mxu0  ;;  %v443_v59 = vpop.f32.mrb[8].mxu1 }
  0xfb   : > { %v1069_v57 = vpop.eup %1068  ;;  %1080 = vpow2.f32 %v847_v54  ;;  %v469_v58 = vmul.f32 %v1282_v14, %v403_v56  ;;  %v981_v60 = vpop.f32.mrb[9].mxu0  ;;  %v479_v63 = vmul.f32 %v1282_v14, %v443_v59 }
  0xfc   : > { %v1071_v61 = vpop.eup %1070  ;;  %v562_v62 = vadd.f32 1.0, %v1069_v57  ;;  %1082 = vpow2.f32 %v857_v55  ;;  %v1001_v0 = vpop.f32.mrb[9].mxu1 }
  0xfd   : > { %v406_v1 = vpop.f32.mrb[10].mxu0  ;;  %v1073_v2 = vpop.eup %1072  ;;  %v572_v3 = vadd.f32 1.0, %v1071_v61  ;;  %v1332_v4 = vadd.f32 %v1287_v16, %v469_v58  ;;  %v1336_v10 = vadd.f32 %v1287_v16, %v479_v63 }
  0xfe   : > { %v470_v5 = vmul.f32 %v1282_v14, %v406_v1  ;;  %v446_v6 = vpop.f32.mrb[10].mxu1  ;;  %v982_v7 = vpop.f32.mrb[11].mxu0  ;;  %1084 = vrcp.f32 %v562_v62  ;;  %v563_v9 = vadd.f32 1.0, %v1073_v2 }
  0xff   : > { %v1075_v8 = vpop.eup %1074  ;;  %v480_v11 = vmul.f32 %v1282_v14, %v446_v6  ;;  %v1002_v12 = vpop.f32.mrb[11].mxu1  ;;  %1086 = vrcp.f32 %v572_v3  ;;  %v848_v15 = vmul.f32 -1.442695, %v1332_v4  ;;  %v858_v18 = vmul.f32 -1.442695, %v1336_v10 }
 0x100   : > { %v573_v13 = vadd.f32 1.0, %v1075_v8  ;;  %v1341_v17 = vadd.f32 %v1287_v16, %v470_v5  ;;  %1088 = vrcp.f32 %v563_v9 }
 0x101   : > { %v1345_v19 = vadd.f32 %v1287_v16, %v480_v11 }
 0x102   : > { %1090 = vrcp.f32 %v573_v13  ;;  %v849_v20 = vmul.f32 -1.442695, %v1341_v17  ;;  %v411_v22 = vpop.f32.mrb[12].mxu0  ;;  %v451_v26 = vpop.f32.mrb[12].mxu1 }
 0x103   : > { %1092 = vpow2.f32 %v848_v15  ;;  %v859_v21 = vmul.f32 -1.442695, %v1345_v19  ;;  %v1077_v24 = vpop.eup %1076  ;;  %v471_v25 = vmul.f32 %v1282_v14, %v411_v22  ;;  %v985_v28 = vpop.f32.mrb[13].mxu0  ;;  %v481_v32 = vmul.f32 %v1282_v14, %v451_v26 }
 0x104   : > { %1094 = vpow2.f32 %v858_v18  ;;  %v1079_v29 = vpop.eup %1078  ;;  %v564_v30 = vadd.f32 1.0, %v1077_v24  ;;  %v1005_v34 = vpop.f32.mrb[13].mxu1 }
 0x105   : > { %1096 = vpow2.f32 %v849_v20  ;;  %v414_v35 = vpop.f32.mrb[14].mxu0  ;;  %v1081_v36 = vpop.eup %1080  ;;  %v574_v37 = vadd.f32 1.0, %v1079_v29  ;;  %v1352_v38 = vadd.f32 %v1287_v16, %v471_v25  ;;  %v1356_v45 = vadd.f32 %v1287_v16, %v481_v32 }
 0x106   : > { %1098 = vpow2.f32 %v859_v21  ;;  %v472_v39 = vmul.f32 %v1282_v14, %v414_v35  ;;  %v454_v40 = vpop.f32.mrb[14].mxu1  ;;  %v986_v41 = vpop.f32.mrb[15].mxu0  ;;  %v565_v44 = vadd.f32 1.0, %v1081_v36 }
 0x107   : > { %v1083_v42 = vpop.eup %1082  ;;  %1100 = vrcp.f32 %v564_v30  ;;  %v482_v46 = vmul.f32 %v1282_v14, %v454_v40  ;;  %v1006_v48 = vpop.f32.mrb[15].mxu1  ;;  %v850_v50 = vmul.f32 -1.442695, %v1352_v38  ;;  %v860_v55 = vmul.f32 -1.442695, %v1356_v45 }
 0x108   : > { %1102 = vrcp.f32 %v574_v37  ;;  %v575_v49 = vadd.f32 1.0, %v1083_v42  ;;  %v1361_v52 = vadd.f32 %v1287_v16, %v472_v39  ;;  %v1085_v54 = vpop.eup %1084 }
 0x109   : > { %1104 = vrcp.f32 %v565_v44  ;;  %v1365_v56 = vadd.f32 %v1287_v16, %v482_v46  ;;  %v1087_v57 = vpop.eup %1086  ;;  %v616_v63 = vmul.f32 %v1085_v54, %v1292_v23 }
 0x10a   : > { %1106 = vrcp.f32 %v575_v49  ;;  %v851_v58 = vmul.f32 -1.442695, %v1361_v52  ;;  %v1089_v59 = vpop.eup %1088  ;;  %v419_v61 = vpop.f32.mrb[16].mxu0  ;;  %v626_v5 = vmul.f32 %v1087_v57, %v1296_v27 }
 0x10b   : > { %1108 = vpow2.f32 %v850_v50  ;;  %v861_v60 = vmul.f32 -1.442695, %v1365_v56  ;;  %v617_v0 = vmul.f32 %v1089_v59, %v1301_v31  ;;  %v473_v1 = vmul.f32 %v1282_v14, %v419_v61  ;;  %v989_v2 = vpop.f32.mrb[17].mxu0 }
 0x10c   : > { %v1091_v62 = vpop.eup %1090  ;;  %1110 = vpow2.f32 %v860_v55  ;;  %v422_v23 = vpop.f32.mrb[18].mxu0 }
 0x10d   : > { %v1093_v3 = vpop.eup %1092  ;;  %v627_v6 = vmul.f32 %v1091_v62, %v1305_v33  ;;  %1112 = vpow2.f32 %v851_v58  ;;  %v903_v31 = vpack.c.bf16 %v617_v0, %v616_v63  ;;  %v1382_v9 = vadd.f32 %v1287_v16, %v473_v1  ;;  %v990_v27 = vpop.f32.mrb[19].mxu0 }
 0x10e   : > { %v1095_v7 = vpop.eup %1094  ;;  %v566_v8 = vadd.f32 1.0, %v1093_v3  ;;  %1114 = vpow2.f32 %v861_v60  ;;  %v474_v15 = vmul.f32 %v1282_v14, %v422_v23 }
 0x10f   : > { %v1097_v11 = vpop.eup %1096  ;;  %v928_v12 = vpack.c.bf16 %v627_v6, %v626_v5  ;;  %v576_v13 = vadd.f32 1.0, %v1095_v7  ;;  %904 = vst [vmem:[%s1378_s15] sm:$0xff] %v903_v31   ;;  %v852_v20 = vmul.f32 -1.442695, %v1382_v9 }
 0x110   : > { %v1099_v18 = vpop.eup %1098  ;;  %1116 = vrcp.f32 %v566_v8  ;;  %v567_v33 = vadd.f32 1.0, %v1097_v11  ;;  %v499_v24 = vadd.f32 %v1287_v16, %v474_v15 }
 0x111   : > { %v1101_v21 = vpop.eup %1100  ;;  %949 = vst [vmem:[%s1378_s15 + $0x28] sm:$0xff] %v928_v12   ;;  %1118 = vrcp.f32 %v576_v13  ;;  %v577_v22 = vadd.f32 1.0, %v1099_v18 }
 0x112   : > { %v1103_v25 = vpop.eup %1102  ;;  %1120 = vrcp.f32 %v567_v33  ;;  %v853_v28 = vmul.f32 -1.442695, %v499_v24  ;;  %v618_v14 = vmul.f32 %v1101_v21, %v1312_v43 }
 0x113   : > { %v1105_v26 = vpop.eup %1104  ;;  %1122 = vrcp.f32 %v577_v22  ;;  %v628_v34 = vmul.f32 %v1103_v25, %v1316_v47 }
 0x114   : > { %v1107_v29 = vpop.eup %1106  ;;  %v619_v30 = vmul.f32 %v1105_v26, %v1321_v51  ;;  %1124 = vpow2.f32 %v852_v20 }
 0x115   : > { %v1109_v32 = vpop.eup %1108  ;;  %v629_v35 = vmul.f32 %v1107_v29, %v1325_v53  ;;  %1126 = vpow2.f32 %v853_v28 }
 0x116   : > { %v1111_v16 = vpop.eup %1110  ;;  %v908_v36 = vpack.c.bf16 %v619_v30, %v618_v14  ;;  %v568_v37 = vadd.f32 1.0, %v1109_v32 }
 0x117   : > { %v1113_v39 = vpop.eup %1112  ;;  %v933_v40 = vpack.c.bf16 %v629_v35, %v628_v34  ;;  %v578_v41 = vadd.f32 1.0, %v1111_v16 }
 0x118   : > { %v1115_v42 = vpop.eup %1114  ;;  %945 = vst [vmem:[%s1378_s15 + $0x8] sm:$0xff] %v908_v36   ;;  %1128 = vrcp.f32 %v568_v37  ;;  %v569_v43 = vadd.f32 1.0, %v1113_v39 }
 0x119   : > { %950 = vst [vmem:[%s1378_s15 + $0x30] sm:$0xff] %v933_v40   ;;  %1130 = vrcp.f32 %v578_v41  ;;  %v579_v51 = vadd.f32 1.0, %v1115_v42 }
 0x11a   : > { %v1117_v44 = vpop.eup %1116  ;;  %1132 = vrcp.f32 %v569_v43 }
 0x11b   : > { %v1119_v47 = vpop.eup %1118  ;;  %1134 = vrcp.f32 %v579_v51  ;;  %v620_v48 = vmul.f32 %v1117_v44, %v1332_v4 }
 0x11c   : > { %v1121_v53 = vpop.eup %1120  ;;  %v630_v54 = vmul.f32 %v1119_v47, %v1336_v10 }
 0x11d   : > { %v1123_v46 = vpop.eup %1122  ;;  %v621_v49 = vmul.f32 %v1121_v53, %v1341_v17 }
 0x11e   : > { %v1125_v50 = vpop.eup %1124  ;;  %v631_v55 = vmul.f32 %v1123_v46, %v1345_v19 }
 0x11f   : > { %v1127_v57 = vpop.eup %1126  ;;  %v913_v58 = vpack.c.bf16 %v621_v49, %v620_v48  ;;  %v570_v59 = vadd.f32 1.0, %v1125_v50 }
 0x120   : > { %v938_v60 = vpack.c.bf16 %v631_v55, %v630_v54  ;;  %v571_v61 = vadd.f32 1.0, %v1127_v57 }
 0x121   : > { %946 = vst [vmem:[%s1378_s15 + $0x10] sm:$0xff] %v913_v58   ;;  %1136 = vrcp.f32 %v570_v59 }
 0x122   : > { %v1129_v62 = vpop.eup %1128  ;;  %951 = vst [vmem:[%s1378_s15 + $0x38] sm:$0xff] %v938_v60   ;;  %1138 = vrcp.f32 %v571_v61 }
 0x123   : > { %v1131_v4 = vpop.eup %1130  ;;  %v622_v10 = vmul.f32 %v1129_v62, %v1352_v38 }
 0x124   : > { %v1133_v17 = vpop.eup %1132  ;;  %v632_v0 = vmul.f32 %v1131_v4, %v1356_v45 }
 0x125   : > { %v1135_v63 = vpop.eup %1134  ;;  %v623_v19 = vmul.f32 %v1133_v17, %v1361_v52 }
 0x126   : > { %v633_v1 = vmul.f32 %v1135_v63, %v1365_v56 }
 0x127   : > { %v918_v2 = vpack.c.bf16 %v623_v19, %v622_v10 }
 0x128   : > { %v943_v3 = vpack.c.bf16 %v633_v1, %v632_v0 }
 0x129   : > { %947 = vst [vmem:[%s1378_s15 + $0x18] sm:$0xff] %v918_v2  }
 0x12a   : > { %952 = vst [vmem:[%s1378_s15 + $0x40] sm:$0xff] %v943_v3  }
 0x12b   : > { %v1137_v5 = vpop.eup %1136 }
 0x12c   : > { %v1139_v6 = vpop.eup %1138  ;;  %v624_v23 = vmul.f32 %v1137_v5, %v1382_v9 }
 0x12d   : > { %v625_v7 = vmul.f32 %v1139_v6, %v499_v24 }
 0x12f   : > { %v923_v31 = vpack.c.bf16 %v625_v7, %v624_v23 }
 0x131   : > { %948 = vst [vmem:[%s1378_s15 + $0x20] sm:$0xff] %v923_v31  }
 0x132 PF: > { %s14_s19 = sadd.s32 1, %s1178_s19   ;;  %s1429_s15 = smov %s1170_s17 }
 0x133   : > { %p11_p7 = scmp.ge.s32.totalorder %s14_s19, 6   ;;  %s1430_s16 = smov %s1174_s18 }
 0x134   : > { %s1431_s17 = smov %s1434_s20  ;;  %s1432_s18 = smov %s1438_s21 }
 0x135   :  { %13 = sbr.rel (!%p11_p7) target bundleno = 3 (0x3), region = 66 }

</bundles_post_ra>
